<compile_context>
chip_gen: v6e
topology: v6e:2x2x1
jax: 0.10.0
libtpu: 0.0.40
codegen_flags: <defaults>
</compile_context>

<pallas_src>
import functools

import jax
import jax.numpy as jnp
from jax.experimental import pallas as pl
from jax.experimental.pallas import tpu as pltpu

LANE = 128


def _round_up(x, m):
    return ((x + m - 1) // m) * m


def pool_kernel(graph_ids_ref, batch_ref, x_ref, partial_ref):
    """Stream one N-tile: one-hot MXU pooling into the resident partial sum."""
    t = pl.program_id(1)

    @pl.when(t == 0)
    def _():
        partial_ref[...] = jnp.zeros_like(partial_ref)

    batch = batch_ref[...]                        # [1, TK] int32, lane-dense
    x = x_ref[...].astype(jnp.float32)            # [TK, D] node features

    # One-hot [B, TK]: resident graph-id column vs lane-dense batch ids.
    # Padded nodes carry the sentinel id `num_graphs` -> all-zero column
    # (matches segment_sum out-of-range drop semantics). No per-tile iota.
    onehot = (graph_ids_ref[...] == batch).astype(jnp.float32)

    # global_add_pool contribution of this tile; f32 accumulation into the
    # output block, which stays resident across the "arbitrary" axis.
    partial_ref[0] = partial_ref[0] + jnp.dot(
        onehot, x, preferred_element_type=jnp.float32)


def mlp_kernel(partial_ref, w1_ref, b1_ref, w2_ref, b2_ref, out_ref):
    """Combine per-split partial sums and apply the 2-layer MLP head."""
    pooled = jnp.sum(partial_ref[...], axis=0)                        # [B, D]
    h = jnp.dot(pooled, w1_ref[...],
                preferred_element_type=jnp.float32) + b1_ref[...]
    h = jnp.where(h > 0, h, 0.01 * h)                                 # LeakyReLU(0.01)
    out = jnp.dot(h, w2_ref[...],
                  preferred_element_type=jnp.float32) + b2_ref[...]
    out_ref[...] = out.astype(out_ref.dtype)


@functools.partial(jax.jit, static_argnames=("num_graphs",))
def head_forward(node_feats, batch_idx, w1, b1, w2, b2, *, num_graphs):
    """node_feats: [N, D] f32, batch_idx: [N, 1] i32 in [0, num_graphs)."""
    n_nodes, d_in = node_feats.shape
    hidden = w1.shape[1]
    out_dim = w2.shape[1]

    # --- byte-budgeted node tiling ------------------------------------------
    d_lane = _round_up(d_in, LANE)            # lane-padded VMEM footprint/row
    buf_budget = 2 * 1024 * 1024              # ~2 MiB of x per pipeline buffer
    tile_n = max(LANE, (buf_budget // (4 * d_lane)) // LANE * LANE)
    tile_n = min(tile_n, _round_up(n_nodes, LANE))

    n_tiles = -(-n_nodes // tile_n)
    num_splits = 2 if n_tiles >= 2 else 1     # one split per v7x TensorCore
    tiles_per_split = -(-n_tiles // num_splits)
    n_pad = num_splits * tiles_per_split * tile_n

    # --- wrapper-side padding (static shapes) --------------------------------
    x_p = jnp.zeros((n_pad, d_in), node_feats.dtype).at[:n_nodes].set(node_feats)
    batch_lane = jnp.full((1, n_pad), num_graphs, jnp.int32)         # sentinel
    batch_lane = batch_lane.at[0, :n_nodes].set(
        batch_idx.reshape(-1).astype(jnp.int32))
    graph_ids = jnp.arange(num_graphs, dtype=jnp.int32).reshape(num_graphs, 1)

    # 48 MiB scoped VMEM: >> budgeted usage, and safe on v7x (64 MiB physical).
    vmem_limit = 48 * 1024 * 1024

    partials = pl.pallas_call(
        pool_kernel,
        out_shape=jax.ShapeDtypeStruct((num_splits, num_graphs, d_in),
                                       jnp.float32),
        grid=(num_splits, tiles_per_split),
        in_specs=[
            pl.BlockSpec((num_graphs, 1), lambda s, t: (0, 0)),       # graph ids
            pl.BlockSpec((1, tile_n),
                         lambda s, t: (0, s * tiles_per_split + t)),  # batch ids
            pl.BlockSpec((tile_n, d_in),
                         lambda s, t: (s * tiles_per_split + t, 0)),  # node feats
        ],
        out_specs=pl.BlockSpec((1, num_graphs, d_in), lambda s, t: (s, 0, 0)),
        compiler_params=pltpu.CompilerParams(
            dimension_semantics=("parallel", "arbitrary"),
            vmem_limit_bytes=vmem_limit,
        ),
    )(graph_ids, batch_lane, x_p)

    # Lane-pad the tiny MLP dims to 128 (zero rows/cols are inert).
    hid_p = _round_up(hidden, LANE)
    out_p = _round_up(out_dim, LANE)
    w1_p = jnp.zeros((d_in, hid_p), jnp.float32).at[:, :hidden].set(w1)
    b1_p = jnp.zeros((1, hid_p), jnp.float32).at[:, :hidden].set(b1.reshape(1, -1))
    w2_p = jnp.zeros((hid_p, out_p), jnp.float32).at[:hidden, :out_dim].set(w2)
    b2_p = jnp.zeros((1, out_p), jnp.float32).at[:, :out_dim].set(b2.reshape(1, -1))

    out_padded = pl.pallas_call(
        mlp_kernel,
        out_shape=jax.ShapeDtypeStruct((num_graphs, out_p), jnp.float32),
        grid=(1,),
        in_specs=[
            pl.BlockSpec((num_splits, num_graphs, d_in), lambda i: (0, 0, 0)),
            pl.BlockSpec((d_in, hid_p), lambda i: (0, 0)),
            pl.BlockSpec((1, hid_p), lambda i: (0, 0)),
            pl.BlockSpec((hid_p, out_p), lambda i: (0, 0)),
            pl.BlockSpec((1, out_p), lambda i: (0, 0)),
        ],
        out_specs=pl.BlockSpec((num_graphs, out_p), lambda i: (0, 0)),
        compiler_params=pltpu.CompilerParams(
            dimension_semantics=("arbitrary",),
        ),
    )(partials, w1_p, b1_p, w2_p, b2_p)

    return out_padded[:, :out_dim]


def reference(node_feats, batch_idx, w1, b1, w2, b2, num_graphs):
    pooled = jax.ops.segment_sum(node_feats, batch_idx[:, 0],
                                 num_segments=num_graphs)
    h = pooled @ w1 + b1
    h = jnp.where(h > 0, h, 0.01 * h)
    return h @ w2 + b2


if __name__ == "__main__":
    key = jax.random.PRNGKey(0)

    # Small shapes consistent with the module.
    num_graphs = 2          # graphs in the batch
    num_nodes = 16          # total nodes across the batch
    backbone_hidden = 32    # backbone.hidden_dim
    hidden_dim = 32         # head hidden_dim
    out_dim = 8             # out_dim

    k_x, k_b, k_w1, k_b1, k_w2, k_b2 = jax.random.split(key, 6)

    node_feats = jax.random.normal(k_x, (num_nodes, backbone_hidden), jnp.float32)
    batch_idx = jnp.sort(
        jax.random.randint(k_b, (num_nodes, 1), 0, num_graphs, jnp.int32), axis=0
    )

    # PyTorch-style Linear init: U(-1/sqrt(fan_in), 1/sqrt(fan_in)),
    # weights stored transposed as [in, out].
    bound1 = 1.0 / jnp.sqrt(backbone_hidden)
    w1 = jax.random.uniform(k_w1, (backbone_hidden, hidden_dim), jnp.float32,
                            -bound1, bound1)
    b1 = jax.random.uniform(k_b1, (1, hidden_dim), jnp.float32, -bound1, bound1)
    bound2 = 1.0 / jnp.sqrt(hidden_dim)
    w2 = jax.random.uniform(k_w2, (hidden_dim, out_dim), jnp.float32,
                            -bound2, bound2)
    b2 = jax.random.uniform(k_b2, (1, out_dim), jnp.float32, -bound2, bound2)

    out = head_forward(node_feats, batch_idx, w1, b1, w2, b2,
                       num_graphs=num_graphs)
    jax.block_until_ready(out)

    ref = reference(node_feats, batch_idx, w1, b1, w2, b2, num_graphs)
    assert out.shape == (num_graphs, out_dim)
    assert jnp.allclose(out, ref, atol=1e-5, rtol=1e-5)

    print("KERNEL_OK")
</pallas_src>

<mosaic_0001>
module attributes {stable_mosaic.version = 11 : i64} {
  func.func @pool_kernel(%arg0: i32, %arg1: i32, %arg2: memref<2x1xi32, #tpu.memory_space<vmem>>, %arg3: memref<1x128xi32, #tpu.memory_space<vmem>>, %arg4: memref<128x32xf32, #tpu.memory_space<vmem>>, %arg5: memref<1x2x32xf32, #tpu.memory_space<vmem>>) attributes {dimension_semantics = [#tpu.dimension_semantics<parallel>, #tpu.dimension_semantics<arbitrary>], iteration_bounds = array<i64: 1, 1>, scalar_prefetch = 0 : i64, scratch_operands = 0 : i64, tpu.core_type = #tpu.core_type<tc>, window_params = [{pipeline_mode = #tpu.pipeline_mode<synchronous>, transform_indices = @transform_0, window_bounds = array<i64: 2, 1>}, {transform_indices = @transform_1, window_bounds = array<i64: 1, 128>}, {transform_indices = @transform_2, window_bounds = array<i64: 128, 32>}, {transform_indices = @transform_3, window_bounds = array<i64: 1, 2, 32>}]} {
    %c0_i32 = arith.constant 0 : i32
    %0 = arith.cmpi eq, %arg1, %c0_i32 : i32
    %1 = arith.extui %0 : i1 to i32
    %c0_i32_0 = arith.constant 0 : i32
    %2 = arith.cmpi ne, %1, %c0_i32_0 : i32
    scf.if %2 {
      %cst_12 = arith.constant 0.000000e+00 : f32
      %18 = vector.broadcast %cst_12 : f32 to vector<1x2x32xf32>
      %c0_13 = arith.constant 0 : index
      %c0_14 = arith.constant 0 : index
      %c0_15 = arith.constant 0 : index
      %19 = vector.load %arg5[%c0_13, %c0_14, %c0_15] : memref<1x2x32xf32, #tpu.memory_space<vmem>>, vector<1x2x32xf32>
      tpu.vector_store %arg5[%c0_13, %c0_14, %c0_15], %18 {strides = array<i32>} : memref<1x2x32xf32, #tpu.memory_space<vmem>>, vector<1x2x32xf32>,
    } else {
    }
    %c0 = arith.constant 0 : index
    %c0_1 = arith.constant 0 : index
    %3 = vector.load %arg3[%c0, %c0_1] : memref<1x128xi32, #tpu.memory_space<vmem>>, vector<1x128xi32>
    %c0_2 = arith.constant 0 : index
    %c0_3 = arith.constant 0 : index
    %4 = vector.load %arg4[%c0_2, %c0_3] : memref<128x32xf32, #tpu.memory_space<vmem>>, vector<128x32xf32>
    %c0_4 = arith.constant 0 : index
    %c0_5 = arith.constant 0 : index
    %5 = vector.load %arg2[%c0_4, %c0_5] : memref<2x1xi32, #tpu.memory_space<vmem>>, vector<2x1xi32>
    %6 = vector.broadcast %5 : vector<2x1xi32> to vector<2x128xi32>
    %7 = vector.broadcast %3 : vector<1x128xi32> to vector<2x128xi32>
    %8 = arith.cmpi eq, %6, %7 : vector<2x128xi32>
    %9 = arith.extui %8 : vector<2x128xi1> to vector<2x128xi32>
    %10 = arith.sitofp %9 : vector<2x128xi32> to vector<2x128xf32>
    %c0_6 = arith.constant 0 : index
    %c0_7 = arith.constant 0 : index
    %c0_8 = arith.constant 0 : index
    %11 = vector.load %arg5[%c0_6, %c0_7, %c0_8] : memref<1x2x32xf32, #tpu.memory_space<vmem>>, vector<1x2x32xf32>
    %12 = vector.shape_cast %11 : vector<1x2x32xf32> to vector<2x32xf32>
    %cst = arith.constant dense<0.000000e+00> : vector<2x32xf32>
    %13 = tpu.matmul %10, %4, %cst {dimension_numbers = #tpu.dot_dimension_numbers<[1], [0], [0], [1], [0, 0, 1, 1], [], []>} : vector<2x128xf32>, vector<128x32xf32>, vector<2x32xf32> -> vector<2x32xf32>
    %14 = arith.addf %12, %13 : vector<2x32xf32>
    %c0_9 = arith.constant 0 : index
    %c0_10 = arith.constant 0 : index
    %c0_11 = arith.constant 0 : index
    %15 = vector.load %arg5[%c0_9, %c0_10, %c0_11] : memref<1x2x32xf32, #tpu.memory_space<vmem>>, vector<1x2x32xf32>
    %16 = vector.shape_cast %15 : vector<1x2x32xf32> to vector<2x32xf32>
    %17 = vector.shape_cast %14 : vector<2x32xf32> to vector<1x2x32xf32>
    tpu.vector_store %arg5[%c0_9, %c0_10, %c0_11], %17 {strides = array<i32>} : memref<1x2x32xf32, #tpu.memory_space<vmem>>, vector<1x2x32xf32>,
    return
  }
  func.func @transform_0(%arg0: i32, %arg1: i32) -> (i32, i32) {
    %c0_i32 = arith.constant 0 : i32
    %c0_i32_0 = arith.constant 0 : i32
    %c0_i32_1 = arith.constant 0 : i32
    return %c0_i32, %c0_i32_0 : i32, i32
  }
  func.func @transform_1(%arg0: i32, %arg1: i32) -> (i32, i32) {
    %c1_i32 = arith.constant 1 : i32
    %0 = arith.muli %arg0, %c1_i32 : i32
    %1 = arith.addi %0, %arg1 : i32
    %c0_i32 = arith.constant 0 : i32
    %c0_i32_0 = arith.constant 0 : i32
    return %c0_i32, %1 : i32, i32
  }
  func.func @transform_2(%arg0: i32, %arg1: i32) -> (i32, i32) {
    %c1_i32 = arith.constant 1 : i32
    %0 = arith.muli %arg0, %c1_i32 : i32
    %1 = arith.addi %0, %arg1 : i32
    %c0_i32 = arith.constant 0 : i32
    %c0_i32_0 = arith.constant 0 : i32
    return %1, %c0_i32 : i32, i32
  }
  func.func @transform_3(%arg0: i32, %arg1: i32) -> (i32, i32, i32) {
    %c0_i32 = arith.constant 0 : i32
    %c0_i32_0 = arith.constant 0 : i32
    %c0_i32_1 = arith.constant 0 : i32
    return %arg0, %c0_i32, %c0_i32_0 : i32, i32, i32
  }
}

module attributes {stable_mosaic.version = 11 : i64} {
  func.func @mlp_kernel(%arg0: i32, %arg1: memref<1x2x32xf32, #tpu.memory_space<vmem>>, %arg2: memref<32x128xf32, #tpu.memory_space<vmem>>, %arg3: memref<1x128xf32, #tpu.memory_space<vmem>>, %arg4: memref<128x128xf32, #tpu.memory_space<vmem>>, %arg5: memref<1x128xf32, #tpu.memory_space<vmem>>, %arg6: memref<2x128xf32, #tpu.memory_space<vmem>>) attributes {dimension_semantics = [#tpu.dimension_semantics<arbitrary>], iteration_bounds = array<i64: 1>, scalar_prefetch = 0 : i64, scratch_operands = 0 : i64, tpu.core_type = #tpu.core_type<tc>, window_params = [{pipeline_mode = #tpu.pipeline_mode<synchronous>, transform_indices = @transform_0, window_bounds = array<i64: 1, 2, 32>}, {pipeline_mode = #tpu.pipeline_mode<synchronous>, transform_indices = @transform_1, window_bounds = array<i64: 32, 128>}, {pipeline_mode = #tpu.pipeline_mode<synchronous>, transform_indices = @transform_2, window_bounds = array<i64: 1, 128>}, {pipeline_mode = #tpu.pipeline_mode<synchronous>, transform_indices = @transform_3, window_bounds = array<i64: 128, 128>}, {pipeline_mode = #tpu.pipeline_mode<synchronous>, transform_indices = @transform_4, window_bounds = array<i64: 1, 128>}, {pipeline_mode = #tpu.pipeline_mode<synchronous>, transform_indices = @transform_5, window_bounds = array<i64: 2, 128>}]} {
    %c0 = arith.constant 0 : index
    %c0_0 = arith.constant 0 : index
    %c0_1 = arith.constant 0 : index
    %0 = vector.load %arg1[%c0, %c0_0, %c0_1] : memref<1x2x32xf32, #tpu.memory_space<vmem>>, vector<1x2x32xf32>
    %cst = arith.constant dense<0.000000e+00> : vector<2x32xf32>
    %1 = vector.multi_reduction <add>, %0, %cst [0] : vector<1x2x32xf32> to vector<2x32xf32>
    %c0_2 = arith.constant 0 : index
    %c0_3 = arith.constant 0 : index
    %2 = vector.load %arg2[%c0_2, %c0_3] : memref<32x128xf32, #tpu.memory_space<vmem>>, vector<32x128xf32>
    %cst_4 = arith.constant dense<0.000000e+00> : vector<2x128xf32>
    %3 = tpu.matmul %1, %2, %cst_4 {dimension_numbers = #tpu.dot_dimension_numbers<[1], [0], [0], [1], [0, 0, 1, 1], [], []>} : vector<2x32xf32>, vector<32x128xf32>, vector<2x128xf32> -> vector<2x128xf32>
    %c0_5 = arith.constant 0 : index
    %c0_6 = arith.constant 0 : index
    %4 = vector.load %arg3[%c0_5, %c0_6] : memref<1x128xf32, #tpu.memory_space<vmem>>, vector<1x128xf32>
    %5 = vector.broadcast %4 : vector<1x128xf32> to vector<2x128xf32>
    %6 = arith.addf %3, %5 : vector<2x128xf32>
    %cst_7 = arith.constant 0.000000e+00 : f32
    %7 = vector.broadcast %cst_7 : f32 to vector<2x128xf32>
    %8 = arith.cmpf ogt, %6, %7 : vector<2x128xf32>
    %cst_8 = arith.constant 0.00999999977 : f32
    %9 = vector.broadcast %cst_8 : f32 to vector<2x128xf32>
    %10 = arith.mulf %9, %6 : vector<2x128xf32>
    %11 = arith.select %8, %6, %10 : vector<2x128xi1>, vector<2x128xf32>
    %c0_9 = arith.constant 0 : index
    %c0_10 = arith.constant 0 : index
    %12 = vector.load %arg4[%c0_9, %c0_10] : memref<128x128xf32, #tpu.memory_space<vmem>>, vector<128x128xf32>
    %cst_11 = arith.constant dense<0.000000e+00> : vector<2x128xf32>
    %13 = tpu.matmul %11, %12, %cst_11 {dimension_numbers = #tpu.dot_dimension_numbers<[1], [0], [0], [1], [0, 0, 1, 1], [], []>} : vector<2x128xf32>, vector<128x128xf32>, vector<2x128xf32> -> vector<2x128xf32>
    %c0_12 = arith.constant 0 : index
    %c0_13 = arith.constant 0 : index
    %14 = vector.load %arg5[%c0_12, %c0_13] : memref<1x128xf32, #tpu.memory_space<vmem>>, vector<1x128xf32>
    %15 = vector.broadcast %14 : vector<1x128xf32> to vector<2x128xf32>
    %16 = arith.addf %13, %15 : vector<2x128xf32>
    %c0_14 = arith.constant 0 : index
    %c0_15 = arith.constant 0 : index
    %17 = vector.load %arg6[%c0_14, %c0_15] : memref<2x128xf32, #tpu.memory_space<vmem>>, vector<2x128xf32>
    tpu.vector_store %arg6[%c0_14, %c0_15], %16 {strides = array<i32>} : memref<2x128xf32, #tpu.memory_space<vmem>>, vector<2x128xf32>,
    return
  }
  func.func @transform_0(%arg0: i32) -> (i32, i32, i32) {
    %c0_i32 = arith.constant 0 : i32
    %c0_i32_0 = arith.constant 0 : i32
    %c0_i32_1 = arith.constant 0 : i32
    %c0_i32_2 = arith.constant 0 : i32
    return %c0_i32, %c0_i32_0, %c0_i32_1 : i32, i32, i32
  }
  func.func @transform_1(%arg0: i32) -> (i32, i32) {
    %c0_i32 = arith.constant 0 : i32
    %c0_i32_0 = arith.constant 0 : i32
    %c0_i32_1 = arith.constant 0 : i32
    return %c0_i32, %c0_i32_0 : i32, i32
  }
  func.func @transform_2(%arg0: i32) -> (i32, i32) {
    %c0_i32 = arith.constant 0 : i32
    %c0_i32_0 = arith.constant 0 : i32
    %c0_i32_1 = arith.constant 0 : i32
    return %c0_i32, %c0_i32_0 : i32, i32
  }
  func.func @transform_3(%arg0: i32) -> (i32, i32) {
    %c0_i32 = arith.constant 0 : i32
    %c0_i32_0 = arith.constant 0 : i32
    %c0_i32_1 = arith.constant 0 : i32
    return %c0_i32, %c0_i32_0 : i32, i32
  }
  func.func @transform_4(%arg0: i32) -> (i32, i32) {
    %c0_i32 = arith.constant 0 : i32
    %c0_i32_0 = arith.constant 0 : i32
    %c0_i32_1 = arith.constant 0 : i32
    return %c0_i32, %c0_i32_0 : i32, i32
  }
  func.func @transform_5(%arg0: i32) -> (i32, i32) {
    %c0_i32 = arith.constant 0 : i32
    %c0_i32_0 = arith.constant 0 : i32
    %c0_i32_1 = arith.constant 0 : i32
    return %c0_i32, %c0_i32_0 : i32, i32
  }
}

</mosaic_0001>

<bundles_post_ra>
// kernel: head_forward.2
= control target key start
LH: loop header
LB: loop body
LE: loop exit
PB: predicated region body
PF: predicated region fallthrough
CT: control target
= control target key end

     0   :  { %v231_v0 = vmov 0   ;;  %v232_v2 = vmov 0.0   ;;  %vm54_vm0 = vcmask 254976   ;;  %vm233_vm1 = vmmov 0   ;;  %s320_s0 = inlined_call_operand.vmem [shape: s32[2,1], index: 0, kind: input, shape index: {}]   ;;  %s321_s2 = inlined_call_operand.vmem [shape: f32[128,32], index: 2, kind: input, shape index: {}]   ;;  %s322_s3 = inlined_call_operand.vmem [shape: f32[1,2,32], index: 3, kind: output, shape index: {}]   ;;  %s323_s1 = inlined_call_operand.vmem [shape: s32[1,128], index: 1, kind: input, shape index: {}]  }
   0x1   :  { %230 = vset.pattern.permute.xlu0 %v231_v0  ;;  %v73_v1 = vld [vmem:[%s320_s0] sm:$0x3]  ;;  %191 = vmatprep.subr.mxu0 %v232_v2  ;;  %v72_v3 = vld [vmem:[%s321_s2 + $0x78] sm:$0xff]  ;;  %v71_v4 = vld [vmem:[%s321_s2 + $0x70] sm:$0xff]  ;;  %55 = vst.msk [vmem:[%s322_s3] sm:$0x3] %vm54_vm0, %v232_v2 }
   0x2   :  { %75 = vperm.xlu0 %230, %v73_v1   ;;  %192 = vmatpush3.msra.mxu0 %v72_v3  ;;  %v70_v5 = vld [vmem:[%s321_s2 + $0x68] sm:$0xff]  ;;  %v69_v6 = vld [vmem:[%s321_s2 + $0x60] sm:$0xff]  ;;  %v68_v7 = vld [vmem:[%s321_s2 + $0x58] sm:$0xff]  ;;  %v234_v21 = vmov 1.0  }
   0x3   :  { %193 = vmatprep.subr.mxu0 %v232_v2  ;;  %223 = vmatprep.mubr.msk.f32.mxu0 %vm233_vm1, %v232_v2  ;;  %v67_v8 = vld [vmem:[%s321_s2 + $0x50] sm:$0xff]  ;;  %v66_v9 = vld [vmem:[%s321_s2 + $0x48] sm:$0xff]  ;;  %v65_v10 = vld [vmem:[%s321_s2 + $0x40] sm:$0xff] }
   0x4   :  { %194 = vmatpush3.msra.mxu0 %v71_v4  ;;  %v64_v11 = vld [vmem:[%s321_s2 + $0x38] sm:$0xff]  ;;  %v63_v12 = vld [vmem:[%s321_s2 + $0x30] sm:$0xff]  ;;  %v62_v13 = vld [vmem:[%s321_s2 + $0x28] sm:$0xff] }
   0x5   :  { %195 = vmatprep.subr.mxu0 %v232_v2  ;;  %v61_v14 = vld [vmem:[%s321_s2 + $0x20] sm:$0xff]  ;;  %v60_v15 = vld [vmem:[%s321_s2 + $0x18] sm:$0xff]  ;;  %v59_v16 = vld [vmem:[%s321_s2 + $0x10] sm:$0xff] }
   0x6   :  { %196 = vmatpush3.msra.mxu0 %v70_v5  ;;  %v58_v17 = vld [vmem:[%s321_s2 + $0x8] sm:$0xff]  ;;  %v57_v18 = vld [vmem:[%s321_s2] sm:$0xff] }
   0x7   :  { %197 = vmatprep.subr.mxu0 %v232_v2  ;;  %v171_v19 = vld [vmem:[%s323_s1] ss:$0 sm:$0xff] }
   0x8   :  { %198 = vmatpush3.msra.mxu0 %v69_v6  ;;  %v84_v22 = vld [vmem:[%s322_s3] sm:$0x3] }
   0x9   :  { %199 = vmatprep.subr.mxu0 %v232_v2 }
   0xa   :  { %200 = vmatpush3.msra.mxu0 %v68_v7 }
   0xb   :  { %201 = vmatprep.subr.mxu0 %v232_v2 }
   0xc   :  { %202 = vmatpush3.msra.mxu0 %v67_v8 }
   0xd   :  { %203 = vmatprep.subr.mxu0 %v232_v2 }
   0xe   :  { %204 = vmatpush3.msra.mxu0 %v66_v9 }
   0xf   :  { %205 = vmatprep.subr.mxu0 %v232_v2 }
  0x10   :  { %206 = vmatpush3.msra.mxu0 %v65_v10 }
  0x11   :  { %207 = vmatprep.subr.mxu0 %v232_v2 }
  0x12   :  { %208 = vmatpush3.msra.mxu0 %v64_v11 }
  0x13   :  { %209 = vmatprep.subr.mxu0 %v232_v2 }
  0x14   :  { %210 = vmatpush3.msra.mxu0 %v63_v12 }
  0x15   :  { %211 = vmatprep.subr.mxu0 %v232_v2 }
  0x16   :  { %212 = vmatpush3.msra.mxu0 %v62_v13 }
  0x17   :  { %213 = vmatprep.subr.mxu0 %v232_v2 }
  0x18   :  { %214 = vmatpush3.msra.mxu0 %v61_v14 }
  0x19   :  { %215 = vmatprep.subr.mxu0 %v232_v2 }
  0x1a   :  { %216 = vmatpush3.msra.mxu0 %v60_v15 }
  0x1b   :  { %217 = vmatprep.subr.mxu0 %v232_v2 }
  0x1c   :  { %218 = vmatpush3.msra.mxu0 %v59_v16 }
  0x1d   :  { %219 = vmatprep.subr.mxu0 %v232_v2 }
  0x1e   :  { %220 = vmatpush3.msra.mxu0 %v58_v17 }
  0x1f   :  { %221 = vmatprep.subr.mxu0 %v232_v2 }
  0x20   :  { %222 = vmatpush3.msra.mxu0 %v57_v18 }
  0x7d   :  { %v76_v20 = vpop.permute.xlu0 %75 }
  0x7e   :  { %vm81_vm2 = vcmp.eq.s32.totalorder %v76_v20, %v171_v19 }
  0x7f   :  { %224 = vmatmul.mubr.msk.f32.vlgmr.msra.gmra.mxu0 %vm81_vm2, %v234_v21 }
 0x13f   :  { %v151_v23 = vpop.f32.mrf.mxu0 }
 0x140   :  { %v155_v24 = vadd.f32 %v151_v23, %v84_v22 }
 0x141   :  { %v225_v25 = vpop.f32.mrf.mxu0 }
 0x142   :  { %157 = vst.msk [vmem:[%s322_s3] sm:$0x3] %vm54_vm0, %v155_v24 }

// kernel: head_forward.3
= control target key start
LH: loop header
LB: loop body
LE: loop exit
PB: predicated region body
PF: predicated region fallthrough
CT: control target
= control target key end

     0   :  { %v315_v1 = vmov 0.0   ;;  %vm316_vm0 = vmmov 0   ;;  %vm34_vm1 = vcmask 261120   ;;  %s444_s0 = inlined_call_operand.vmem [shape: f32[1,2,32], index: 0, kind: input, shape index: {}]   ;;  %s445_s1 = inlined_call_operand.vmem [shape: f32[32,128], index: 1, kind: input, shape index: {}]   ;;  %s446_s2 = inlined_call_operand.vmem [shape: f32[1,128], index: 2, kind: input, shape index: {}]   ;;  %s447_s3 = inlined_call_operand.vmem [shape: f32[128,128], index: 3, kind: input, shape index: {}]   ;;  %s448_s4 = inlined_call_operand.vmem [shape: f32[1,128], index: 4, kind: input, shape index: {}]   ;;  %s449_s5 = inlined_call_operand.hbm [shape: f32[2,128], index: 5, kind: output, shape index: {}]  }
   0x1   :  { %v26_v0 = vld [vmem:[%s445_s1 + $0x18] sm:$0xff]  ;;  %244 = vmatprep.subr.mxu0 %v315_v1  ;;  %v25_v2 = vld [vmem:[%s445_s1 + $0x10] sm:$0xff]  ;;  %252 = vmatprep.mubr.msk.f32.mxu0 %vm316_vm0, %v315_v1  ;;  %v24_v5 = vld [vmem:[%s445_s1 + $0x8] sm:$0xff] }
   0x2   :  { %v126_v3 = vld [vmem:[%s447_s3 + $0x78] sm:$0xff]  ;;  %245 = vmatpush3.msra.mxu0 %v26_v0  ;;  %255 = vmatprep.subr.mxu1 %v315_v1  ;;  %v125_v4 = vld [vmem:[%s447_s3 + $0x70] sm:$0xff]  ;;  %v124_v6 = vld [vmem:[%s447_s3 + $0x68] sm:$0xff] }
   0x3   :  { %246 = vmatprep.subr.mxu0 %v315_v1  ;;  %256 = vmatpush3.msra.mxu1 %v126_v3  ;;  %v23_v7 = vld [vmem:[%s445_s1] sm:$0xff] }
   0x4   :  { %247 = vmatpush3.msra.mxu0 %v25_v2  ;;  %257 = vmatprep.subr.mxu1 %v315_v1  ;;  %v21_v8 = vld [vmem:[%s444_s0] sm:$0x3] }
   0x5   :  { %248 = vmatprep.subr.mxu0 %v315_v1  ;;  %258 = vmatpush3.msra.mxu1 %v125_v4  ;;  %v123_v9 = vld [vmem:[%s447_s3 + $0x60] sm:$0xff] }
   0x6   :  { %249 = vmatpush3.msra.mxu0 %v24_v5  ;;  %259 = vmatprep.subr.mxu1 %v315_v1 }
   0x7   :  { %10 = vsyncpa [#allocation3], 0  ;;  %250 = vmatprep.subr.mxu0 %v315_v1  ;;  %260 = vmatpush3.msra.mxu1 %v124_v6  ;;  %v122_v10 = vld [vmem:[%s447_s3 + $0x58] sm:$0xff]  ;;  %v121_v11 = vld [vmem:[%s447_s3 + $0x50] sm:$0xff]  ;;  %s317_s11 = smov [#allocation2]  }
   0x8   :  { %251 = vmatpush3.msra.mxu0 %v23_v7  ;;  %261 = vmatprep.subr.mxu1 %v315_v1  ;;  %v120_v12 = vld [vmem:[%s447_s3 + $0x48] sm:$0xff]  ;;  %v119_v13 = vld [vmem:[%s447_s3 + $0x40] sm:$0xff]  ;;  %v118_v14 = vld [vmem:[%s447_s3 + $0x38] sm:$0xff] }
   0x9   :  { %253 = vmatmul.mubr.msk.f32.vlgmr.msra.gmra.mxu0 %vm34_vm1, %v21_v8  ;;  %262 = vmatpush3.msra.mxu1 %v123_v9  ;;  %v117_v15 = vld [vmem:[%s447_s3 + $0x30] sm:$0xff]  ;;  %v116_v16 = vld [vmem:[%s447_s3 + $0x28] sm:$0xff]  ;;  %v115_v17 = vld [vmem:[%s447_s3 + $0x20] sm:$0xff] }
   0xa   :  { %263 = vmatprep.subr.mxu1 %v315_v1  ;;  %287 = vmatprep.mubr.msk.f32.mxu1 %vm316_vm0, %v315_v1  ;;  %v114_v18 = vld [vmem:[%s447_s3 + $0x18] sm:$0xff]  ;;  %v113_v19 = vld [vmem:[%s447_s3 + $0x10] sm:$0xff]  ;;  %v112_v20 = vld [vmem:[%s447_s3 + $0x8] sm:$0xff] }
   0xb   :  { %264 = vmatpush3.msra.mxu1 %v122_v10  ;;  %v111_v21 = vld [vmem:[%s447_s3] sm:$0xff]  ;;  %s211_s3 = sshll.u32 %s317_s11, 4  ;;  %s212_s3 = int_to_ptr.vmem [resolvable:$true] %s211_s3 }
   0xc   :  { %265 = vmatprep.subr.mxu1 %v315_v1  ;;  %v219_v22 = vld [vmem:[%s446_s2] ss:$0 sm:$0xff]  ;;  %s293_s0 = scalar_lea.vmem %s212_s3, 32  ;;  %p298_p1 = scmp.lt.s32.totalorder %s212_s3, %s212_s3 }
   0xd   :  { %266 = vmatpush3.msra.mxu1 %v121_v11  ;;  %v221_v28 = vld [vmem:[%s448_s4] ss:$0 sm:$0xff]  ;;  %p294_p0 = scmp.ne.s32.totalorder %s212_s3, %s293_s0  ;;  %p299_p2 = scmp.lt.s32.totalorder %s293_s0, %s293_s0 }
   0xe   :  { %267 = vmatprep.subr.mxu1 %v315_v1 }
   0xf   :  { %268 = vmatpush3.msra.mxu1 %v120_v12  ;;  %p300_p3 = por %p299_p2, %p298_p1 }
  0x10   :  { %269 = vmatprep.subr.mxu1 %v315_v1 }
  0x11   :  { %270 = vmatpush3.msra.mxu1 %v119_v13  ;;  %p301_p4 = pnand %p300_p3, %p294_p0 }
  0x12   :  { %271 = vmatprep.subr.mxu1 %v315_v1 }
  0x13   :  { %272 = vmatpush3.msra.mxu1 %v118_v14 }
  0x14   :  { %273 = vmatprep.subr.mxu1 %v315_v1 }
  0x15   :  { %274 = vmatpush3.msra.mxu1 %v117_v15 }
  0x16   :  { %275 = vmatprep.subr.mxu1 %v315_v1 }
  0x17   :  { %276 = vmatpush3.msra.mxu1 %v116_v16 }
  0x18   :  { %277 = vmatprep.subr.mxu1 %v315_v1 }
  0x19   :  { %278 = vmatpush3.msra.mxu1 %v115_v17 }
  0x1a   :  { %279 = vmatprep.subr.mxu1 %v315_v1 }
  0x1b   :  { %280 = vmatpush3.msra.mxu1 %v114_v18 }
  0x1c   :  { %281 = vmatprep.subr.mxu1 %v315_v1 }
  0x1d   :  { %282 = vmatpush3.msra.mxu1 %v113_v19 }
  0x1e   :  { %283 = vmatprep.subr.mxu1 %v315_v1 }
  0x1f   :  { %284 = vmatpush3.msra.mxu1 %v112_v20 }
  0x20   :  { %285 = vmatprep.subr.mxu1 %v315_v1 }
  0x21   :  { %286 = vmatpush3.msra.mxu1 %v111_v21 }
  0xc9   :  { %v104_v23 = vpop.f32.mrf.mxu0 }
  0xca   :  { %v105_v24 = vadd.f32 %v219_v22, %v104_v23 }
  0xcb   :  { %v254_v25 = vpop.f32.mrf.mxu0 }
  0xcc   :  { %v109_v26 = vmul.f32 0.01, %v105_v24  ;;  %vm108_vm2 = vcmp.gt.f32.partialorder %v105_v24, 0.0 }
  0xce   :  { %v110_v27 = vsel %vm108_vm2, %v105_v24, %v109_v26 }
  0xcf   :  { %288 = vmatmul.mubr.f32.vlgmr.msra.gmra.mxu1 %v110_v27 }
 0x18f   :  { %v200_v29 = vpop.f32.mrf.mxu1 }
 0x190   :  { %v201_v30 = vadd.f32 %v221_v28, %v200_v29 }
 0x191   :  { %v289_v31 = vpop.f32.mrf.mxu1 }
 0x192   :  { %204 = vst [vmem:[#allocation2] sm:$0x3] %v201_v30 }
 0x193   :  { %304 = shalt.err (!%p301_p4)
}
 0x194   :  { %214 = dma.vmem_to_hbm [thread:$0]  %s212_s3, 32, %s449_s5, [#allocation3]  }
 0x195   :  { %313 = dma.done.wait [#allocation3], 32  }
 0x196   :  { %314 = vsyncadd [#allocation3], 4294967264 }
 0x197   :  { %218 = vsyncpa [#allocation3], 1 }

</bundles_post_ra>
